<compile_context>
chip_gen: v7x
topology: tpu7x:2x2x1
jax: 0.10.0
libtpu: 0.0.40
codegen_flags: <defaults>
</compile_context>

<pallas_src>
import jax
import jax.numpy as jnp
from jax.experimental import pallas as pl
from jax.experimental.pallas import tpu as pltpu


def add_relu_conv1x1_kernel(x1_ref, x2_ref, w_ref, o_ref):
    # x1_ref, x2_ref: (Cin, tm) f32 views of the NCHW inputs (batch dim squeezed).
    # w_ref         : (Cout, Cin), VMEM-resident across the whole grid.
    # o_ref         : (Cout, tm) f32 (tm is a multiple of 128 or the full HW axis).
    xr = jnp.maximum(x1_ref[...] + x2_ref[...], 0.0)          # f32 add + relu (VPU)
    w = w_ref[...].astype(jnp.bfloat16)                       # no-op if already bf16
    o_ref[...] = jnp.dot(
        w, xr.astype(jnp.bfloat16),                           # bf16 MXU operands
        preferred_element_type=jnp.float32,                   # f32 accumulation
    ).astype(o_ref.dtype)


def add_relu_conv1x1(x320, x322, weight, *, tm=512):
    """x320, x322: (N, Cin, H, W) f32; weight: (Cout, Cin, 1, 1) f32 or bf16.
    Returns (N, Cout, H, W) == conv2d(relu(x320 + x322), weight, bias=False)."""
    N, Cin, H, W = x320.shape
    Cout = weight.shape[0]
    M = H * W

    # Free reshapes: NCHW is already contiguous as (N, Cin, H*W).
    x1 = x320.reshape(N, Cin, M)
    x2 = x322.reshape(N, Cin, M)
    # (Cout, Cin, 1, 1) -> (Cout, Cin). NO dtype cast here (perf review item 1);
    # the kernel body casts to bf16 under its own memory slack.
    w = weight.reshape(Cout, Cin)

    # HW tile: a multiple of 128 lanes, or the full axis if it is small.
    tm_eff = tm if M > tm else M
    grid_m = pl.cdiv(M, tm_eff)
    # v7x has 2 TensorCores that only get used if a parallel grid axis has >= 2
    # steps; never let the HW axis collapse to one block when the batch can't
    # feed the second core.
    if N == 1 and grid_m < 2 and M >= 256:
        tm_eff = pl.cdiv(pl.cdiv(M, 2), 128) * 128
        grid_m = pl.cdiv(M, tm_eff)

    in_bytes = jnp.dtype(x320.dtype).itemsize
    w_bytes = jnp.dtype(w.dtype).itemsize
    cost = pl.CostEstimate(
        flops=2 * N * Cout * Cin * M + 2 * N * Cin * M,
        transcendentals=0,
        bytes_accessed=2 * N * Cin * M * in_bytes
        + Cout * Cin * w_bytes
        + N * Cout * M * in_bytes,
    )

    out_flat = pl.pallas_call(
        add_relu_conv1x1_kernel,
        out_shape=jax.ShapeDtypeStruct((N, Cout, M), x320.dtype),
        grid_spec=pltpu.PrefetchScalarGridSpec(
            num_scalar_prefetch=0,
            grid=(N, grid_m),
            in_specs=[
                pl.BlockSpec((None, Cin, tm_eff), lambda n, m: (n, 0, m)),  # x1 tile
                pl.BlockSpec((None, Cin, tm_eff), lambda n, m: (n, 0, m)),  # x2 tile
                pl.BlockSpec((Cout, Cin), lambda n, m: (0, 0)),             # resident W
            ],
            out_specs=pl.BlockSpec((None, Cout, tm_eff), lambda n, m: (n, 0, m)),
        ),
        compiler_params=pltpu.CompilerParams(
            dimension_semantics=("parallel", "parallel"),
            # ~26 MiB needed at the production shape with tm=512 (f32 weight,
            # double buffering); 48 MiB leaves headroom and stays below v7x's
            # 64 MiB physical VMEM (v5e/v6e have 128 MiB physical).
            vmem_limit_bytes=48 * 1024 * 1024,
        ),
        cost_estimate=cost,
    )(x1, x2, w)

    return out_flat.reshape(N, Cout, H, W)


if __name__ == "__main__":
    # Small shapes consistent with the module's forward
    # (original: (1, 2048, 28, 28) -> (1, 512, 28, 28)).
    N, Cin, Cout, H, W = 2, 256, 64, 20, 20

    key = jax.random.PRNGKey(0)
    k1, k2, k3 = jax.random.split(key, 3)
    x320 = jax.random.normal(k1, (N, Cin, H, W), dtype=jnp.float32)
    x322 = jax.random.normal(k2, (N, Cin, H, W), dtype=jnp.float32)
    # deterministic weight init for Conv2d(Cin, Cout, 1, 1, bias=False)
    weight = jax.random.normal(k3, (Cout, Cin, 1, 1), dtype=jnp.float32) * (1.0 / Cin) ** 0.5

    # pure-JAX f32 reference (module semantics)
    xr = jnp.maximum(x320 + x322, 0.0)
    ref = jnp.einsum("nchw,oc->nohw", xr, weight.reshape(Cout, Cin))

    # 1) Default config: tm=512 > HW=400 -> full-axis tile, grid (2, 1).
    out = jax.block_until_ready(add_relu_conv1x1(x320, x322, weight))
    assert out.shape == (N, Cout, H, W)
    assert jnp.allclose(out, ref, atol=3e-2, rtol=3e-2), float(jnp.max(jnp.abs(out - ref)))

    # 2) Smaller tile: exercises the masked partial edge block (400 % 256 = 144),
    #    the same path the production shape (HW = 784, tm = 512) uses.
    out2 = jax.block_until_ready(add_relu_conv1x1(x320, x322, weight, tm=256))
    assert jnp.allclose(out2, ref, atol=3e-2, rtol=3e-2), float(jnp.max(jnp.abs(out2 - ref)))

    # 3) N == 1: exercises the "keep >= 2 parallel HW steps" rule (v7x megacore)
    #    and a pre-cast bf16 weight (the recommended zero-extra-traffic path).
    out3 = jax.block_until_ready(
        add_relu_conv1x1(x320[:1], x322[:1], weight.astype(jnp.bfloat16))
    )
    assert jnp.allclose(out3, ref[:1], atol=3e-2, rtol=3e-2), float(
        jnp.max(jnp.abs(out3 - ref[:1]))
    )

    print("KERNEL_OK")
</pallas_src>

<mosaic_0001>
module attributes {stable_mosaic.version = 11 : i64} {
  func.func @add_relu_conv1x1_kernel(%arg0: i32, %arg1: i32, %arg2: memref<1x256x400xf32, #tpu.memory_space<vmem>>, %arg3: memref<1x256x400xf32, #tpu.memory_space<vmem>>, %arg4: memref<64x256xf32, #tpu.memory_space<vmem>>, %arg5: memref<1x64x400xf32, #tpu.memory_space<vmem>>) attributes {dimension_semantics = [#tpu.dimension_semantics<parallel>, #tpu.dimension_semantics<parallel>], iteration_bounds = array<i64: 2, 1>, scalar_prefetch = 0 : i64, scratch_operands = 0 : i64, tpu.core_type = #tpu.core_type<tc>, window_params = [{transform_indices = @transform_0, window_bounds = array<i64: 1, 256, 400>}, {transform_indices = @transform_1, window_bounds = array<i64: 1, 256, 400>}, {pipeline_mode = #tpu.pipeline_mode<synchronous>, transform_indices = @transform_2, window_bounds = array<i64: 64, 256>}, {transform_indices = @transform_3, window_bounds = array<i64: 1, 64, 400>}]} {
    %c0 = arith.constant 0 : index
    %c0_0 = arith.constant 0 : index
    %c0_1 = arith.constant 0 : index
    %0 = vector.load %arg2[%c0, %c0_0, %c0_1] : memref<1x256x400xf32, #tpu.memory_space<vmem>>, vector<1x256x400xf32>
    %1 = vector.shape_cast %0 : vector<1x256x400xf32> to vector<256x400xf32>
    %c0_2 = arith.constant 0 : index
    %c0_3 = arith.constant 0 : index
    %c0_4 = arith.constant 0 : index
    %2 = vector.load %arg3[%c0_2, %c0_3, %c0_4] : memref<1x256x400xf32, #tpu.memory_space<vmem>>, vector<1x256x400xf32>
    %3 = vector.shape_cast %2 : vector<1x256x400xf32> to vector<256x400xf32>
    %4 = arith.addf %1, %3 : vector<256x400xf32>
    %cst = arith.constant 0.000000e+00 : f32
    %5 = vector.broadcast %cst : f32 to vector<256x400xf32>
    %6 = arith.maximumf %4, %5 : vector<256x400xf32>
    %c0_5 = arith.constant 0 : index
    %c0_6 = arith.constant 0 : index
    %7 = vector.load %arg4[%c0_5, %c0_6] : memref<64x256xf32, #tpu.memory_space<vmem>>, vector<64x256xf32>
    %8 = arith.truncf %7 : vector<64x256xf32> to vector<64x256xbf16>
    %9 = arith.truncf %6 : vector<256x400xf32> to vector<256x400xbf16>
    %cst_7 = arith.constant dense<0.000000e+00> : vector<64x400xf32>
    %10 = tpu.matmul %8, %9, %cst_7 {dimension_numbers = #tpu.dot_dimension_numbers<[1], [0], [0], [1], [0, 0, 1, 1], [], []>} : vector<64x256xbf16>, vector<256x400xbf16>, vector<64x400xf32> -> vector<64x400xf32>
    %c0_8 = arith.constant 0 : index
    %c0_9 = arith.constant 0 : index
    %c0_10 = arith.constant 0 : index
    %11 = vector.load %arg5[%c0_8, %c0_9, %c0_10] : memref<1x64x400xf32, #tpu.memory_space<vmem>>, vector<1x64x400xf32>
    %12 = vector.shape_cast %11 : vector<1x64x400xf32> to vector<64x400xf32>
    %13 = vector.shape_cast %10 : vector<64x400xf32> to vector<1x64x400xf32>
    tpu.vector_store %arg5[%c0_8, %c0_9, %c0_10], %13 {strides = array<i32>} : memref<1x64x400xf32, #tpu.memory_space<vmem>>, vector<1x64x400xf32>,
    return
  }
  func.func @transform_0(%arg0: i32, %arg1: i32) -> (i32, i32, i32) {
    %c0_i32 = arith.constant 0 : i32
    %c0_i32_0 = arith.constant 0 : i32
    return %arg0, %c0_i32, %arg1 : i32, i32, i32
  }
  func.func @transform_1(%arg0: i32, %arg1: i32) -> (i32, i32, i32) {
    %c0_i32 = arith.constant 0 : i32
    %c0_i32_0 = arith.constant 0 : i32
    return %arg0, %c0_i32, %arg1 : i32, i32, i32
  }
  func.func @transform_2(%arg0: i32, %arg1: i32) -> (i32, i32) {
    %c0_i32 = arith.constant 0 : i32
    %c0_i32_0 = arith.constant 0 : i32
    %c0_i32_1 = arith.constant 0 : i32
    return %c0_i32, %c0_i32_0 : i32, i32
  }
  func.func @transform_3(%arg0: i32, %arg1: i32) -> (i32, i32, i32) {
    %c0_i32 = arith.constant 0 : i32
    %c0_i32_0 = arith.constant 0 : i32
    return %arg0, %c0_i32, %arg1 : i32, i32, i32
  }
}

</mosaic_0001>

<bundles_post_ra>
// kernel: tpu_custom_call.1
= control target key start
LH: loop header
LB: loop body
LE: loop exit
PB: predicated region body
PF: predicated region fallthrough
CT: control target
= control target key end

     0   :  { %8 = vsyncpa [#allocation3], 0  ;;  %s1779_s0 = inlined_call_operand.vmem [shape: f32[2,256,400], index: 0, kind: input, shape index: {}]   ;;  %s1780_s1 = inlined_call_operand.vmem [shape: f32[2,256,400], index: 1, kind: input, shape index: {}]   ;;  %s1781_s2 = inlined_call_operand.vmem [shape: f32[64,256], index: 2, kind: input, shape index: {}]   ;;  %s1782_s3 = inlined_call_operand.hbm [shape: f32[2,64,400], index: 3, kind: output, shape index: {}]  }
   0x1   :  { %10 = vsyncpa [#allocation3 + $0x1], 0  ;;  %s1306_s12 = smov 0   ;;  %s1308_s13 = smov 0  }
   0x2   :  { %s1310_s14 = smov 0   ;;  %s1312_s15 = smov 0  }
   0x3   :  { %s1314_s16 = smov 0   ;;  %s1316_s17 = smov 0  }
   0x4 LB: > { %s1128_s18 = sadd.s32 4294967295, %s1281_s17   ;;  %s1129_s19 = sadd.s32 4294967294, %s1281_s17   ;;  %s1281_s17 = sphi %s1316_s17, %s16_s17   ;;  %s1277_s16 = sphi %s1314_s16, %s1789_s16   ;;  %s1273_s15 = sphi %s1312_s15, %s1788_s15   ;;  %s1269_s14 = sphi %s1310_s14, %s1787_s14   ;;  %s1265_s13 = sphi %s1308_s13, %s1786_s13   ;;  %s1261_s12 = sphi %s1306_s12, %s1785_s12  }
   0x5   : > { %s28_s20 = sadd.s32 1, %s1277_s16  ;;  %s114_s21 = sadd.s32 1, %s1269_s14 }
   0x6   : > { %p30_p0 = scmp.ge.s32.totalorder %s28_s20, 2  ;;  %p124_p1 = scmp.ne.s32.totalorder %s1269_s14, %s1265_s13 }
   0x7   : > { %p125_p2 = scmp.eq.s32.totalorder %s1128_s18, 1  ;;  %p130_p3 = scmp.ne.s32.totalorder %s1265_s13, %s1261_s12 }
   0x8   : > { %s1791_s20 = smov (%p30_p0, %s28_s20), 0  ;;  %p131_p5 = scmp.eq.s32.totalorder %s1129_s19, 1 }
   0x9   : > { %p1346_p4 = por %p125_p2, %p124_p1  ;;  %s109_s23 = ssub.s32 %s1277_s16, %s1791_s20 }
   0xa   : > { %p1132_p6 = scmp.ge.s32.totalorder %s1281_s17, 1  ;;  %p112_p7 = scmp.eq.s32.totalorder %s109_s23, 0 }
   0xb   : > { %p1353_p8 = por %p131_p5, %p130_p3  ;;  %p178_p9 = scmp.lt.s32.totalorder %s1281_s17, 3 }
   0xc   : > { %s1359_s25 = scalar_select %p112_p7, %s1269_s14, %s114_s21  }
   0xd   : > { %p179_p10 = pnand %p1132_p6, %p178_p9 }
   0xe   : > { %p216_p11 = scmp.lt.s32.totalorder (!%p179_p10), %s1273_s15, 1  ;;  %v749_v0 = vld [vmem:[%s1781_s2 + $0x8] sm:$0xff] (!%p179_p10)  ;;  %v751_v1 = vld [vmem:[%s1781_s2 + $0x18] sm:$0xff] (!%p179_p10)  ;;  %s212_s5 = sand.u32 (!%p179_p10), 1, %s1265_s13   ;;  %vm985_vm0 = vcmask (!%p179_p10), 130048  }
   0xf   : > { %182 = sbr.rel (%p179_p10) target bundleno = 377 (0x179), region = 32  ;;  %v765_v2 = vpack.c.bf16 (!%p179_p10), %v751_v1, %v749_v0  ;;  %s1133_s6 = sshll.u32 (!%p179_p10), %s212_s5, 8 }
  0x10   : > { %s1145_s8 = sshll.u32 (!%p179_p10), %s1273_s15, 12  ;;  %s1283_s21 = smov (!%p179_p10), [#allocation2]  }
  0x11   : > { %868 = vmatprep.mubr.bf16.mxu0 (!%p179_p10), %v765_v2  ;;  %941 = vmatprep.mubr.bf16.mxu1 (!%p179_p10), %v765_v2  ;;  %s1721_s18 = scalar_lea.hbm (!%p179_p10), %s1782_s3, %s1145_s8  ;;  %s1207_s23 = sshll.u32 (!%p179_p10), %s1283_s21, 4  ;;  %s1208_s23 = int_to_ptr.vmem [resolvable:$false] %s1207_s23 }
  0x12   : > { %s1209_s26 = scalar_lea.vmem (!%p179_p10), %s1208_s23, 8192 }
  0x16   : > { %s217_s30 = scalar_select %p216_p11, %s1273_s15, 1 }
  0x17   : > { %s1733_s15 = scalar_lea.sflag [#allocation3], %s212_s5 }
  0x18   : > { %s1143_s4 = sshll.u32 %s217_s30, 10 }
  0x19   : > { %s1372_s7 = scalar_lea.vmem %s1779_s0, %s1143_s4  ;;  %s1377_s10 = scalar_lea.vmem %s1780_s1, %s1143_s4 }
  0x1a   : > { %v237_v3 = vld [vmem:[%s1372_s7 + $0x8] sm:$0xff]  ;;  %v239_v8 = vld [vmem:[%s1372_s7 + $0x18] sm:$0xff]  ;;  %v236_v13 = vld [vmem:[%s1372_s7] sm:$0xff] }
  0x1b   : > { %v241_v4 = vld [vmem:[%s1372_s7 + $0x28] sm:$0xff]  ;;  %v243_v9 = vld [vmem:[%s1372_s7 + $0x38] sm:$0xff]  ;;  %v240_v17 = vld [vmem:[%s1372_s7 + $0x20] sm:$0xff] }
  0x1c   : > { %v365_v5 = vld [vmem:[%s1377_s10 + $0x8] sm:$0xff]  ;;  %v367_v11 = vld [vmem:[%s1377_s10 + $0x18] sm:$0xff]  ;;  %v364_v18 = vld [vmem:[%s1377_s10] sm:$0xff] }
  0x1d   : > { %v369_v6 = vld [vmem:[%s1377_s10 + $0x28] sm:$0xff]  ;;  %v493_v7 = vadd.f32 %v365_v5, %v237_v3  ;;  %v371_v12 = vld [vmem:[%s1377_s10 + $0x38] sm:$0xff]  ;;  %v495_v15 = vadd.f32 %v367_v11, %v239_v8  ;;  %v368_v19 = vld [vmem:[%s1377_s10 + $0x20] sm:$0xff]  ;;  %v492_v21 = vadd.f32 %v364_v18, %v236_v13 }
  0x1e   : > { %v497_v10 = vadd.f32 %v369_v6, %v241_v4  ;;  %v499_v16 = vadd.f32 %v371_v12, %v243_v9  ;;  %v496_v22 = vadd.f32 %v368_v19, %v240_v17  ;;  %v238_v23 = vld [vmem:[%s1372_s7 + $0x10] sm:$0xff]  ;;  %v245_v30 = vld [vmem:[%s1372_s7 + $0x48] sm:$0xff]  ;;  %v247_v38 = vld [vmem:[%s1372_s7 + $0x58] sm:$0xff] }
  0x1f   : > { %v621_v14 = vmax.f32 %v493_v7, 0.0  ;;  %v242_v24 = vld [vmem:[%s1372_s7 + $0x30] sm:$0xff]  ;;  %v623_v26 = vmax.f32 %v495_v15, 0.0  ;;  %v249_v31 = vld [vmem:[%s1372_s7 + $0x68] sm:$0xff]  ;;  %v620_v33 = vmax.f32 %v492_v21, 0.0  ;;  %v251_v43 = vld [vmem:[%s1372_s7 + $0x78] sm:$0xff] }
  0x20   : > { %v625_v20 = vmax.f32 %v497_v10, 0.0  ;;  %v366_v25 = vld [vmem:[%s1377_s10 + $0x10] sm:$0xff]  ;;  %v627_v27 = vmax.f32 %v499_v16, 0.0  ;;  %v624_v34 = vmax.f32 %v496_v22, 0.0  ;;  %v373_v36 = vld [vmem:[%s1377_s10 + $0x48] sm:$0xff]  ;;  %v375_v44 = vld [vmem:[%s1377_s10 + $0x58] sm:$0xff] }
  0x21   : > { %v370_v28 = vld [vmem:[%s1377_s10 + $0x30] sm:$0xff]  ;;  %v494_v29 = vadd.f32 %v366_v25, %v238_v23  ;;  %v377_v37 = vld [vmem:[%s1377_s10 + $0x68] sm:$0xff]  ;;  %v501_v41 = vadd.f32 %v373_v36, %v245_v30  ;;  %v379_v45 = vld [vmem:[%s1377_s10 + $0x78] sm:$0xff]  ;;  %v503_v48 = vadd.f32 %v375_v44, %v247_v38 }
  0x22   : > { %v773_v32 = vpack.c.bf16 %v625_v20, %v621_v14  ;;  %v498_v35 = vadd.f32 %v370_v28, %v242_v24  ;;  %v775_v39 = vpack.c.bf16 %v627_v27, %v623_v26  ;;  %v505_v42 = vadd.f32 %v377_v37, %v249_v31  ;;  %v244_v50 = vld [vmem:[%s1372_s7 + $0x40] sm:$0xff]  ;;  %v246_v57 = vld [vmem:[%s1372_s7 + $0x50] sm:$0xff]  ;;  %v253_v1 = vld [vmem:[%s1372_s7 + $0x88] sm:$0xff] }
  0x23   : > { %v622_v40 = vmax.f32 %v494_v29, 0.0  ;;  %v772_v46 = vpack.c.bf16 %v624_v34, %v620_v33  ;;  %v507_v49 = vadd.f32 %v379_v45, %v251_v43  ;;  %v248_v51 = vld [vmem:[%s1372_s7 + $0x60] sm:$0xff]  ;;  %v629_v53 = vmax.f32 %v501_v41, 0.0  ;;  %v250_v58 = vld [vmem:[%s1372_s7 + $0x70] sm:$0xff]  ;;  %v257_v6 = vld [vmem:[%s1372_s7 + $0xa8] sm:$0xff] }
  0x24   : > { %836 = vmatprep.subr.bf16.mxu0 %v773_v32  ;;  %v626_v47 = vmax.f32 %v498_v35, 0.0  ;;  %v372_v52 = vld [vmem:[%s1377_s10 + $0x40] sm:$0xff]  ;;  %909 = vmatprep.subr.bf16.mxu1 %v775_v39  ;;  %v633_v54 = vmax.f32 %v505_v42, 0.0  ;;  %v631_v60 = vmax.f32 %v503_v48, 0.0  ;;  %v374_v63 = vld [vmem:[%s1377_s10 + $0x50] sm:$0xff]  ;;  %v381_v7 = vld [vmem:[%s1377_s10 + $0x88] sm:$0xff] }
  0x25   : > { %v376_v55 = vld [vmem:[%s1377_s10 + $0x60] sm:$0xff]  ;;  %v500_v56 = vadd.f32 %v372_v52, %v244_v50  ;;  %837 = vmatpush1.bf16.msra.mxu0 %v772_v46  ;;  %v635_v61 = vmax.f32 %v507_v49, 0.0  ;;  %v378_v0 = vld [vmem:[%s1377_s10 + $0x70] sm:$0xff]  ;;  %v502_v4 = vadd.f32 %v374_v63, %v246_v57  ;;  %v385_v8 = vld [vmem:[%s1377_s10 + $0xa8] sm:$0xff]  ;;  %v509_v11 = vadd.f32 %v381_v7, %v253_v1 }
  0x26   : > { %v774_v59 = vpack.c.bf16 %v626_v47, %v622_v40  ;;  %v504_v62 = vadd.f32 %v376_v55, %v248_v51  ;;  %v777_v2 = vpack.c.bf16 %v633_v54, %v629_v53  ;;  %v506_v5 = vadd.f32 %v378_v0, %v250_v58  ;;  %v255_v13 = vld [vmem:[%s1372_s7 + $0x98] sm:$0xff]  ;;  %v252_v20 = vld [vmem:[%s1372_s7 + $0x80] sm:$0xff]  ;;  %v254_v28 = vld [vmem:[%s1372_s7 + $0x90] sm:$0xff] }
  0x27   : > { %v628_v3 = vmax.f32 %v500_v56, 0.0  ;;  %v779_v9 = vpack.c.bf16 %v635_v61, %v631_v60  ;;  %v513_v12 = vadd.f32 %v385_v8, %v257_v6  ;;  %v259_v14 = vld [vmem:[%s1372_s7 + $0xb8] sm:$0xff]  ;;  %v630_v16 = vmax.f32 %v502_v4, 0.0  ;;  %v256_v21 = vld [vmem:[%s1372_s7 + $0xa0] sm:$0xff]  ;;  %v258_v33 = vld [vmem:[%s1372_s7 + $0xb0] sm:$0xff] }
  0x28   : > { %910 = vmatpush1.bf16.msra.mxu1 %v774_v59  ;;  %v632_v10 = vmax.f32 %v504_v62, 0.0  ;;  %v383_v15 = vld [vmem:[%s1377_s10 + $0x98] sm:$0xff]  ;;  %838 = vmatprep.subr.bf16.mxu0 %v777_v2  ;;  %v634_v17 = vmax.f32 %v506_v5, 0.0  ;;  %v637_v23 = vmax.f32 %v509_v11, 0.0  ;;  %v380_v26 = vld [vmem:[%s1377_s10 + $0x80] sm:$0xff]  ;;  %v382_v34 = vld [vmem:[%s1377_s10 + $0x90] sm:$0xff] }
  0x29   : > { %v387_v18 = vld [vmem:[%s1377_s10 + $0xb8] sm:$0xff]  ;;  %v511_v19 = vadd.f32 %v383_v15, %v255_v13  ;;  %911 = vmatprep.subr.bf16.mxu1 %v779_v9  ;;  %v641_v24 = vmax.f32 %v513_v12, 0.0  ;;  %v384_v27 = vld [vmem:[%s1377_s10 + $0xa0] sm:$0xff]  ;;  %v508_v31 = vadd.f32 %v380_v26, %v252_v20  ;;  %v386_v35 = vld [vmem:[%s1377_s10 + $0xb0] sm:$0xff]  ;;  %v510_v38 = vadd.f32 %v382_v34, %v254_v28 }
  0x2a   : > { %v776_v22 = vpack.c.bf16 %v632_v10, %v628_v3  ;;  %v515_v25 = vadd.f32 %v387_v18, %v259_v14  ;;  %v778_v29 = vpack.c.bf16 %v634_v17, %v630_v16  ;;  %v512_v32 = vadd.f32 %v384_v27, %v256_v21  ;;  %v261_v40 = vld [vmem:[%s1372_s7 + $0xc8] sm:$0xff]  ;;  %v263_v47 = vld [vmem:[%s1372_s7 + $0xd8] sm:$0xff]  ;;  %v260_v55 = vld [vmem:[%s1372_s7 + $0xc0] sm:$0xff] }
  0x2b   : > { %v639_v30 = vmax.f32 %v511_v19, 0.0  ;;  %v781_v36 = vpack.c.bf16 %v641_v24, %v637_v23  ;;  %v514_v39 = vadd.f32 %v386_v35, %v258_v33  ;;  %v265_v41 = vld [vmem:[%s1372_s7 + $0xe8] sm:$0xff]  ;;  %v636_v43 = vmax.f32 %v508_v31, 0.0  ;;  %v267_v48 = vld [vmem:[%s1372_s7 + $0xf8] sm:$0xff]  ;;  %v264_v60 = vld [vmem:[%s1372_s7 + $0xe0] sm:$0xff] }
  0x2c   : > { %839 = vmatpush1.bf16.msra.mxu0 %v776_v22  ;;  %v643_v37 = vmax.f32 %v515_v25, 0.0  ;;  %v389_v42 = vld [vmem:[%s1377_s10 + $0xc8] sm:$0xff]  ;;  %912 = vmatpush1.bf16.msra.mxu1 %v778_v29  ;;  %v640_v44 = vmax.f32 %v512_v32, 0.0  ;;  %v638_v50 = vmax.f32 %v510_v38, 0.0  ;;  %v391_v53 = vld [vmem:[%s1377_s10 + $0xd8] sm:$0xff]  ;;  %v388_v61 = vld [vmem:[%s1377_s10 + $0xc0] sm:$0xff] }
  0x2d   : > { %v393_v45 = vld [vmem:[%s1377_s10 + $0xe8] sm:$0xff]  ;;  %v517_v46 = vadd.f32 %v389_v42, %v261_v40  ;;  %840 = vmatprep.subr.bf16.mxu0 %v781_v36  ;;  %v642_v51 = vmax.f32 %v514_v39, 0.0  ;;  %v395_v54 = vld [vmem:[%s1377_s10 + $0xf8] sm:$0xff]  ;;  %v519_v58 = vadd.f32 %v391_v53, %v263_v47  ;;  %v392_v62 = vld [vmem:[%s1377_s10 + $0xe0] sm:$0xff]  ;;  %v516_v1 = vadd.f32 %v388_v61, %v260_v55 }
  0x2e   : > { %v783_v49 = vpack.c.bf16 %v643_v37, %v639_v30  ;;  %v521_v52 = vadd.f32 %v393_v45, %v265_v41  ;;  %v780_v56 = vpack.c.bf16 %v640_v44, %v636_v43  ;;  %v523_v59 = vadd.f32 %v395_v54, %v267_v48  ;;  %v262_v3 = vld [vmem:[%s1372_s7 + $0xd0] sm:$0xff]  ;;  %v269_v10 = vld [vmem:[%s1372_s7 + $0x108] sm:$0xff]  ;;  %v271_v18 = vld [vmem:[%s1372_s7 + $0x118] sm:$0xff] }
  0x2f   : > { %v645_v57 = vmax.f32 %v517_v46, 0.0  ;;  %v782_v63 = vpack.c.bf16 %v642_v51, %v638_v50  ;;  %v520_v2 = vadd.f32 %v392_v62, %v264_v60  ;;  %v266_v4 = vld [vmem:[%s1372_s7 + $0xf0] sm:$0xff]  ;;  %v647_v6 = vmax.f32 %v519_v58, 0.0  ;;  %v273_v11 = vld [vmem:[%s1372_s7 + $0x128] sm:$0xff]  ;;  %v275_v23 = vld [vmem:[%s1372_s7 + $0x138] sm:$0xff] }
  0x30   : > { %913 = vmatprep.subr.bf16.mxu1 %v783_v49  ;;  %v649_v0 = vmax.f32 %v521_v52, 0.0  ;;  %v390_v5 = vld [vmem:[%s1377_s10 + $0xd0] sm:$0xff]  ;;  %841 = vmatpush1.bf16.msra.mxu0 %v780_v56  ;;  %v651_v7 = vmax.f32 %v523_v59, 0.0  ;;  %v644_v13 = vmax.f32 %v516_v1, 0.0  ;;  %v397_v16 = vld [vmem:[%s1377_s10 + $0x108] sm:$0xff]  ;;  %v399_v24 = vld [vmem:[%s1377_s10 + $0x118] sm:$0xff] }
  0x31   : > { %v394_v8 = vld [vmem:[%s1377_s10 + $0xf0] sm:$0xff]  ;;  %v518_v9 = vadd.f32 %v390_v5, %v262_v3  ;;  %914 = vmatpush1.bf16.msra.mxu1 %v782_v63  ;;  %v648_v14 = vmax.f32 %v520_v2, 0.0  ;;  %v401_v17 = vld [vmem:[%s1377_s10 + $0x128] sm:$0xff]  ;;  %v525_v21 = vadd.f32 %v397_v16, %v269_v10  ;;  %v403_v25 = vld [vmem:[%s1377_s10 + $0x138] sm:$0xff]  ;;  %v527_v28 = vadd.f32 %v399_v24, %v271_v18 }
  0x32   : > { %v785_v12 = vpack.c.bf16 %v649_v0, %v645_v57  ;;  %v522_v15 = vadd.f32 %v394_v8, %v266_v4  ;;  %v787_v19 = vpack.c.bf16 %v651_v7, %v647_v6  ;;  %v529_v22 = vadd.f32 %v401_v17, %v273_v11  ;;  %v268_v30 = vld [vmem:[%s1372_s7 + $0x100] sm:$0xff]  ;;  %v270_v37 = vld [vmem:[%s1372_s7 + $0x110] sm:$0xff]  ;;  %v277_v45 = vld [vmem:[%s1372_s7 + $0x148] sm:$0xff] }
  0x33   : > { %v646_v20 = vmax.f32 %v518_v9, 0.0  ;;  %v784_v26 = vpack.c.bf16 %v648_v14, %v644_v13  ;;  %v531_v29 = vadd.f32 %v403_v25, %v275_v23  ;;  %v272_v31 = vld [vmem:[%s1372_s7 + $0x120] sm:$0xff]  ;;  %v653_v33 = vmax.f32 %v525_v21, 0.0  ;;  %v274_v38 = vld [vmem:[%s1372_s7 + $0x130] sm:$0xff]  ;;  %v281_v50 = vld [vmem:[%s1372_s7 + $0x168] sm:$0xff] }
  0x34   : > { %842 = vmatprep.subr.bf16.mxu0 %v785_v12  ;;  %v650_v27 = vmax.f32 %v522_v15, 0.0  ;;  %v396_v32 = vld [vmem:[%s1377_s10 + $0x100] sm:$0xff]  ;;  %915 = vmatprep.subr.bf16.mxu1 %v787_v19  ;;  %v657_v34 = vmax.f32 %v529_v22, 0.0  ;;  %v655_v40 = vmax.f32 %v527_v28, 0.0  ;;  %v398_v43 = vld [vmem:[%s1377_s10 + $0x110] sm:$0xff]  ;;  %v405_v51 = vld [vmem:[%s1377_s10 + $0x148] sm:$0xff] }
  0x35   : > { %v400_v35 = vld [vmem:[%s1377_s10 + $0x120] sm:$0xff]  ;;  %v524_v36 = vadd.f32 %v396_v32, %v268_v30  ;;  %843 = vmatpush1.bf16.msra.mxu0 %v784_v26  ;;  %v659_v41 = vmax.f32 %v531_v29, 0.0  ;;  %v402_v44 = vld [vmem:[%s1377_s10 + $0x130] sm:$0xff]  ;;  %v526_v48 = vadd.f32 %v398_v43, %v270_v37  ;;  %v409_v52 = vld [vmem:[%s1377_s10 + $0x168] sm:$0xff]  ;;  %v533_v55 = vadd.f32 %v405_v51, %v277_v45 }
  0x36   : > { %v786_v39 = vpack.c.bf16 %v650_v27, %v646_v20  ;;  %v528_v42 = vadd.f32 %v400_v35, %v272_v31  ;;  %v789_v46 = vpack.c.bf16 %v657_v34, %v653_v33  ;;  %v530_v49 = vadd.f32 %v402_v44, %v274_v38  ;;  %v279_v57 = vld [vmem:[%s1372_s7 + $0x158] sm:$0xff]  ;;  %v276_v0 = vld [vmem:[%s1372_s7 + $0x140] sm:$0xff]  ;;  %v278_v8 = vld [vmem:[%s1372_s7 + $0x150] sm:$0xff] }
  0x37   : > { %v652_v47 = vmax.f32 %v524_v36, 0.0  ;;  %v791_v53 = vpack.c.bf16 %v659_v41, %v655_v40  ;;  %v537_v56 = vadd.f32 %v409_v52, %v281_v50  ;;  %v283_v58 = vld [vmem:[%s1372_s7 + $0x178] sm:$0xff]  ;;  %v654_v60 = vmax.f32 %v526_v48, 0.0  ;;  %v280_v1 = vld [vmem:[%s1372_s7 + $0x160] sm:$0xff]  ;;  %v282_v13 = vld [vmem:[%s1372_s7 + $0x170] sm:$0xff] }
  0x38   : > { %916 = vmatpush1.bf16.msra.mxu1 %v786_v39  ;;  %v656_v54 = vmax.f32 %v528_v42, 0.0  ;;  %v407_v59 = vld [vmem:[%s1377_s10 + $0x158] sm:$0xff]  ;;  %844 = vmatprep.subr.bf16.mxu0 %v789_v46  ;;  %v658_v61 = vmax.f32 %v530_v49, 0.0  ;;  %v661_v3 = vmax.f32 %v533_v55, 0.0  ;;  %v404_v6 = vld [vmem:[%s1377_s10 + $0x140] sm:$0xff]  ;;  %v406_v14 = vld [vmem:[%s1377_s10 + $0x150] sm:$0xff] }
  0x39   : > { %v411_v62 = vld [vmem:[%s1377_s10 + $0x178] sm:$0xff]  ;;  %v535_v63 = vadd.f32 %v407_v59, %v279_v57  ;;  %917 = vmatprep.subr.bf16.mxu1 %v791_v53  ;;  %v665_v4 = vmax.f32 %v537_v56, 0.0  ;;  %v408_v7 = vld [vmem:[%s1377_s10 + $0x160] sm:$0xff]  ;;  %v532_v11 = vadd.f32 %v404_v6, %v276_v0  ;;  %v410_v15 = vld [vmem:[%s1377_s10 + $0x170] sm:$0xff]  ;;  %v534_v18 = vadd.f32 %v406_v14, %v278_v8 }
  0x3a   : > { %v788_v2 = vpack.c.bf16 %v656_v54, %v652_v47  ;;  %v539_v5 = vadd.f32 %v411_v62, %v283_v58  ;;  %v790_v9 = vpack.c.bf16 %v658_v61, %v654_v60  ;;  %v536_v12 = vadd.f32 %v408_v7, %v280_v1  ;;  %v285_v20 = vld [vmem:[%s1372_s7 + $0x188] sm:$0xff]  ;;  %v287_v27 = vld [vmem:[%s1372_s7 + $0x198] sm:$0xff]  ;;  %v284_v35 = vld [vmem:[%s1372_s7 + $0x180] sm:$0xff] }
  0x3b   : > { %v663_v10 = vmax.f32 %v535_v63, 0.0  ;;  %v793_v16 = vpack.c.bf16 %v665_v4, %v661_v3  ;;  %v538_v19 = vadd.f32 %v410_v15, %v282_v13  ;;  %v289_v21 = vld [vmem:[%s1372_s7 + $0x1a8] sm:$0xff]  ;;  %v660_v23 = vmax.f32 %v532_v11, 0.0  ;;  %v291_v28 = vld [vmem:[%s1372_s7 + $0x1b8] sm:$0xff]  ;;  %v288_v40 = vld [vmem:[%s1372_s7 + $0x1a0] sm:$0xff] }
  0x3c   : > { %845 = vmatpush1.bf16.msra.mxu0 %v788_v2  ;;  %v667_v17 = vmax.f32 %v539_v5, 0.0  ;;  %v413_v22 = vld [vmem:[%s1377_s10 + $0x188] sm:$0xff]  ;;  %918 = vmatpush1.bf16.msra.mxu1 %v790_v9  ;;  %v664_v24 = vmax.f32 %v536_v12, 0.0  ;;  %v662_v30 = vmax.f32 %v534_v18, 0.0  ;;  %v415_v33 = vld [vmem:[%s1377_s10 + $0x198] sm:$0xff]  ;;  %v412_v41 = vld [vmem:[%s1377_s10 + $0x180] sm:$0xff] }
  0x3d   : > { %v417_v25 = vld [vmem:[%s1377_s10 + $0x1a8] sm:$0xff]  ;;  %v541_v26 = vadd.f32 %v413_v22, %v285_v20  ;;  %846 = vmatprep.subr.bf16.mxu0 %v793_v16  ;;  %v666_v31 = vmax.f32 %v538_v19, 0.0  ;;  %v419_v34 = vld [vmem:[%s1377_s10 + $0x1b8] sm:$0xff]  ;;  %v543_v38 = vadd.f32 %v415_v33, %v287_v27  ;;  %v416_v42 = vld [vmem:[%s1377_s10 + $0x1a0] sm:$0xff]  ;;  %v540_v45 = vadd.f32 %v412_v41, %v284_v35 }
  0x3e   : > { %v795_v29 = vpack.c.bf16 %v667_v17, %v663_v10  ;;  %v545_v32 = vadd.f32 %v417_v25, %v289_v21  ;;  %v792_v36 = vpack.c.bf16 %v664_v24, %v660_v23  ;;  %v547_v39 = vadd.f32 %v419_v34, %v291_v28  ;;  %v286_v47 = vld [vmem:[%s1372_s7 + $0x190] sm:$0xff]  ;;  %v293_v54 = vld [vmem:[%s1372_s7 + $0x1c8] sm:$0xff]  ;;  %v295_v62 = vld [vmem:[%s1372_s7 + $0x1d8] sm:$0xff] }
  0x3f   : > { %v669_v37 = vmax.f32 %v541_v26, 0.0  ;;  %v794_v43 = vpack.c.bf16 %v666_v31, %v662_v30  ;;  %v544_v46 = vadd.f32 %v416_v42, %v288_v40  ;;  %v290_v48 = vld [vmem:[%s1372_s7 + $0x1b0] sm:$0xff]  ;;  %v671_v50 = vmax.f32 %v543_v38, 0.0  ;;  %v297_v55 = vld [vmem:[%s1372_s7 + $0x1e8] sm:$0xff]  ;;  %v299_v3 = vld [vmem:[%s1372_s7 + $0x1f8] sm:$0xff] }
  0x40   : > { %919 = vmatprep.subr.bf16.mxu1 %v795_v29  ;;  %v673_v44 = vmax.f32 %v545_v32, 0.0  ;;  %v414_v49 = vld [vmem:[%s1377_s10 + $0x190] sm:$0xff]  ;;  %847 = vmatpush1.bf16.msra.mxu0 %v792_v36  ;;  %v675_v51 = vmax.f32 %v547_v39, 0.0  ;;  %v668_v57 = vmax.f32 %v540_v45, 0.0  ;;  %v421_v60 = vld [vmem:[%s1377_s10 + $0x1c8] sm:$0xff]  ;;  %v423_v4 = vld [vmem:[%s1377_s10 + $0x1d8] sm:$0xff] }
  0x41   : > { %v418_v52 = vld [vmem:[%s1377_s10 + $0x1b0] sm:$0xff]  ;;  %v542_v53 = vadd.f32 %v414_v49, %v286_v47  ;;  %920 = vmatpush1.bf16.msra.mxu1 %v794_v43  ;;  %v672_v58 = vmax.f32 %v544_v46, 0.0  ;;  %v425_v61 = vld [vmem:[%s1377_s10 + $0x1e8] sm:$0xff]  ;;  %v549_v1 = vadd.f32 %v421_v60, %v293_v54  ;;  %v427_v5 = vld [vmem:[%s1377_s10 + $0x1f8] sm:$0xff]  ;;  %v551_v8 = vadd.f32 %v423_v4, %v295_v62 }
  0x42   : > { %v797_v56 = vpack.c.bf16 %v673_v44, %v669_v37  ;;  %v546_v59 = vadd.f32 %v418_v52, %v290_v48  ;;  %v799_v63 = vpack.c.bf16 %v675_v51, %v671_v50  ;;  %v553_v2 = vadd.f32 %v425_v61, %v297_v55  ;;  %v292_v10 = vld [vmem:[%s1372_s7 + $0x1c0] sm:$0xff]  ;;  %v294_v17 = vld [vmem:[%s1372_s7 + $0x1d0] sm:$0xff]  ;;  %v301_v25 = vld [vmem:[%s1372_s7 + $0x208] sm:$0xff] }
  0x43   : > { %v670_v0 = vmax.f32 %v542_v53, 0.0  ;;  %v796_v6 = vpack.c.bf16 %v672_v58, %v668_v57  ;;  %v555_v9 = vadd.f32 %v427_v5, %v299_v3  ;;  %v296_v11 = vld [vmem:[%s1372_s7 + $0x1e0] sm:$0xff]  ;;  %v677_v13 = vmax.f32 %v549_v1, 0.0  ;;  %v298_v18 = vld [vmem:[%s1372_s7 + $0x1f0] sm:$0xff]  ;;  %v305_v30 = vld [vmem:[%s1372_s7 + $0x228] sm:$0xff] }
  0x44   : > { %848 = vmatprep.subr.bf16.mxu0 %v797_v56  ;;  %v674_v7 = vmax.f32 %v546_v59, 0.0  ;;  %v420_v12 = vld [vmem:[%s1377_s10 + $0x1c0] sm:$0xff]  ;;  %921 = vmatprep.subr.bf16.mxu1 %v799_v63  ;;  %v681_v14 = vmax.f32 %v553_v2, 0.0  ;;  %v679_v20 = vmax.f32 %v551_v8, 0.0  ;;  %v422_v23 = vld [vmem:[%s1377_s10 + $0x1d0] sm:$0xff]  ;;  %v429_v31 = vld [vmem:[%s1377_s10 + $0x208] sm:$0xff] }
  0x45   : > { %v424_v15 = vld [vmem:[%s1377_s10 + $0x1e0] sm:$0xff]  ;;  %v548_v16 = vadd.f32 %v420_v12, %v292_v10  ;;  %849 = vmatpush1.bf16.msra.mxu0 %v796_v6  ;;  %v683_v21 = vmax.f32 %v555_v9, 0.0  ;;  %v426_v24 = vld [vmem:[%s1377_s10 + $0x1f0] sm:$0xff]  ;;  %v550_v28 = vadd.f32 %v422_v23, %v294_v17  ;;  %v433_v32 = vld [vmem:[%s1377_s10 + $0x228] sm:$0xff]  ;;  %v557_v35 = vadd.f32 %v429_v31, %v301_v25 }
  0x46   : > { %v798_v19 = vpack.c.bf16 %v674_v7, %v670_v0  ;;  %v552_v22 = vadd.f32 %v424_v15, %v296_v11  ;;  %v801_v26 = vpack.c.bf16 %v681_v14, %v677_v13  ;;  %v554_v29 = vadd.f32 %v426_v24, %v298_v18  ;;  %v303_v37 = vld [vmem:[%s1372_s7 + $0x218] sm:$0xff]  ;;  %v300_v44 = vld [vmem:[%s1372_s7 + $0x200] sm:$0xff]  ;;  %v302_v52 = vld [vmem:[%s1372_s7 + $0x210] sm:$0xff] }
  0x47   : > { %v676_v27 = vmax.f32 %v548_v16, 0.0  ;;  %v803_v33 = vpack.c.bf16 %v683_v21, %v679_v20  ;;  %v561_v36 = vadd.f32 %v433_v32, %v305_v30  ;;  %v307_v38 = vld [vmem:[%s1372_s7 + $0x238] sm:$0xff]  ;;  %v678_v40 = vmax.f32 %v550_v28, 0.0  ;;  %v304_v45 = vld [vmem:[%s1372_s7 + $0x220] sm:$0xff]  ;;  %v306_v57 = vld [vmem:[%s1372_s7 + $0x230] sm:$0xff] }
  0x48   : > { %922 = vmatpush1.bf16.msra.mxu1 %v798_v19  ;;  %v680_v34 = vmax.f32 %v552_v22, 0.0  ;;  %v431_v39 = vld [vmem:[%s1377_s10 + $0x218] sm:$0xff]  ;;  %850 = vmatprep.subr.bf16.mxu0 %v801_v26  ;;  %v682_v41 = vmax.f32 %v554_v29, 0.0  ;;  %v685_v47 = vmax.f32 %v557_v35, 0.0  ;;  %v428_v50 = vld [vmem:[%s1377_s10 + $0x200] sm:$0xff]  ;;  %v430_v58 = vld [vmem:[%s1377_s10 + $0x210] sm:$0xff] }
  0x49   : > { %v435_v42 = vld [vmem:[%s1377_s10 + $0x238] sm:$0xff]  ;;  %v559_v43 = vadd.f32 %v431_v39, %v303_v37  ;;  %923 = vmatprep.subr.bf16.mxu1 %v803_v33  ;;  %v689_v48 = vmax.f32 %v561_v36, 0.0  ;;  %v432_v51 = vld [vmem:[%s1377_s10 + $0x220] sm:$0xff]  ;;  %v556_v55 = vadd.f32 %v428_v50, %v300_v44  ;;  %v434_v59 = vld [vmem:[%s1377_s10 + $0x230] sm:$0xff]  ;;  %v558_v62 = vadd.f32 %v430_v58, %v302_v52 }
  0x4a   : > { %v800_v46 = vpack.c.bf16 %v680_v34, %v676_v27  ;;  %v563_v49 = vadd.f32 %v435_v42, %v307_v38  ;;  %v802_v53 = vpack.c.bf16 %v682_v41, %v678_v40  ;;  %v560_v56 = vadd.f32 %v432_v51, %v304_v45  ;;  %v309_v0 = vld [vmem:[%s1372_s7 + $0x248] sm:$0xff]  ;;  %v311_v7 = vld [vmem:[%s1372_s7 + $0x258] sm:$0xff]  ;;  %v308_v15 = vld [vmem:[%s1372_s7 + $0x240] sm:$0xff] }
  0x4b   : > { %v687_v54 = vmax.f32 %v559_v43, 0.0  ;;  %v805_v60 = vpack.c.bf16 %v689_v48, %v685_v47  ;;  %v562_v63 = vadd.f32 %v434_v59, %v306_v57  ;;  %v313_v1 = vld [vmem:[%s1372_s7 + $0x268] sm:$0xff]  ;;  %v684_v3 = vmax.f32 %v556_v55, 0.0  ;;  %v315_v8 = vld [vmem:[%s1372_s7 + $0x278] sm:$0xff]  ;;  %v312_v20 = vld [vmem:[%s1372_s7 + $0x260] sm:$0xff] }
  0x4c   : > { %851 = vmatpush1.bf16.msra.mxu0 %v800_v46  ;;  %v691_v61 = vmax.f32 %v563_v49, 0.0  ;;  %v437_v2 = vld [vmem:[%s1377_s10 + $0x248] sm:$0xff]  ;;  %924 = vmatpush1.bf16.msra.mxu1 %v802_v53  ;;  %v688_v4 = vmax.f32 %v560_v56, 0.0  ;;  %v686_v10 = vmax.f32 %v558_v62, 0.0  ;;  %v439_v13 = vld [vmem:[%s1377_s10 + $0x258] sm:$0xff]  ;;  %v436_v21 = vld [vmem:[%s1377_s10 + $0x240] sm:$0xff] }
  0x4d   : > { %v441_v5 = vld [vmem:[%s1377_s10 + $0x268] sm:$0xff]  ;;  %v565_v6 = vadd.f32 %v437_v2, %v309_v0  ;;  %852 = vmatprep.subr.bf16.mxu0 %v805_v60  ;;  %v690_v11 = vmax.f32 %v562_v63, 0.0  ;;  %v443_v14 = vld [vmem:[%s1377_s10 + $0x278] sm:$0xff]  ;;  %v567_v18 = vadd.f32 %v439_v13, %v311_v7  ;;  %v440_v22 = vld [vmem:[%s1377_s10 + $0x260] sm:$0xff]  ;;  %v564_v25 = vadd.f32 %v436_v21, %v308_v15 }
  0x4e   : > { %v807_v9 = vpack.c.bf16 %v691_v61, %v687_v54  ;;  %v569_v12 = vadd.f32 %v441_v5, %v313_v1  ;;  %v804_v16 = vpack.c.bf16 %v688_v4, %v684_v3  ;;  %v571_v19 = vadd.f32 %v443_v14, %v315_v8  ;;  %v310_v27 = vld [vmem:[%s1372_s7 + $0x250] sm:$0xff]  ;;  %v317_v34 = vld [vmem:[%s1372_s7 + $0x288] sm:$0xff]  ;;  %v319_v42 = vld [vmem:[%s1372_s7 + $0x298] sm:$0xff] }
  0x4f   : > { %v693_v17 = vmax.f32 %v565_v6, 0.0  ;;  %v806_v23 = vpack.c.bf16 %v690_v11, %v686_v10  ;;  %v568_v26 = vadd.f32 %v440_v22, %v312_v20  ;;  %v314_v28 = vld [vmem:[%s1372_s7 + $0x270] sm:$0xff]  ;;  %v695_v30 = vmax.f32 %v567_v18, 0.0  ;;  %v321_v35 = vld [vmem:[%s1372_s7 + $0x2a8] sm:$0xff]  ;;  %v323_v47 = vld [vmem:[%s1372_s7 + $0x2b8] sm:$0xff] }
  0x50   : > { %925 = vmatprep.subr.bf16.mxu1 %v807_v9  ;;  %v697_v24 = vmax.f32 %v569_v12, 0.0  ;;  %v438_v29 = vld [vmem:[%s1377_s10 + $0x250] sm:$0xff]  ;;  %853 = vmatpush1.bf16.msra.mxu0 %v804_v16  ;;  %v699_v31 = vmax.f32 %v571_v19, 0.0  ;;  %v692_v37 = vmax.f32 %v564_v25, 0.0  ;;  %v445_v40 = vld [vmem:[%s1377_s10 + $0x288] sm:$0xff]  ;;  %v447_v48 = vld [vmem:[%s1377_s10 + $0x298] sm:$0xff] }
  0x51   : > { %v442_v32 = vld [vmem:[%s1377_s10 + $0x270] sm:$0xff]  ;;  %v566_v33 = vadd.f32 %v438_v29, %v310_v27  ;;  %926 = vmatpush1.bf16.msra.mxu1 %v806_v23  ;;  %v696_v38 = vmax.f32 %v568_v26, 0.0  ;;  %v449_v41 = vld [vmem:[%s1377_s10 + $0x2a8] sm:$0xff]  ;;  %v573_v45 = vadd.f32 %v445_v40, %v317_v34  ;;  %v451_v49 = vld [vmem:[%s1377_s10 + $0x2b8] sm:$0xff]  ;;  %v575_v52 = vadd.f32 %v447_v48, %v319_v42 }
  0x52   : > { %v809_v36 = vpack.c.bf16 %v697_v24, %v693_v17  ;;  %v570_v39 = vadd.f32 %v442_v32, %v314_v28  ;;  %v811_v43 = vpack.c.bf16 %v699_v31, %v695_v30  ;;  %v577_v46 = vadd.f32 %v449_v41, %v321_v35  ;;  %v316_v54 = vld [vmem:[%s1372_s7 + $0x280] sm:$0xff]  ;;  %v318_v61 = vld [vmem:[%s1372_s7 + $0x290] sm:$0xff]  ;;  %v325_v5 = vld [vmem:[%s1372_s7 + $0x2c8] sm:$0xff] }
  0x53   : > { %v694_v44 = vmax.f32 %v566_v33, 0.0  ;;  %v808_v50 = vpack.c.bf16 %v696_v38, %v692_v37  ;;  %v579_v53 = vadd.f32 %v451_v49, %v323_v47  ;;  %v320_v55 = vld [vmem:[%s1372_s7 + $0x2a0] sm:$0xff]  ;;  %v701_v57 = vmax.f32 %v573_v45, 0.0  ;;  %v322_v62 = vld [vmem:[%s1372_s7 + $0x2b0] sm:$0xff]  ;;  %v329_v10 = vld [vmem:[%s1372_s7 + $0x2e8] sm:$0xff] }
  0x54   : > { %854 = vmatprep.subr.bf16.mxu0 %v809_v36  ;;  %v698_v51 = vmax.f32 %v570_v39, 0.0  ;;  %v444_v56 = vld [vmem:[%s1377_s10 + $0x280] sm:$0xff]  ;;  %927 = vmatprep.subr.bf16.mxu1 %v811_v43  ;;  %v705_v58 = vmax.f32 %v577_v46, 0.0  ;;  %v703_v0 = vmax.f32 %v575_v52, 0.0  ;;  %v446_v3 = vld [vmem:[%s1377_s10 + $0x290] sm:$0xff]  ;;  %v453_v11 = vld [vmem:[%s1377_s10 + $0x2c8] sm:$0xff] }
  0x55   : > { %v448_v59 = vld [vmem:[%s1377_s10 + $0x2a0] sm:$0xff]  ;;  %v572_v60 = vadd.f32 %v444_v56, %v316_v54  ;;  %855 = vmatpush1.bf16.msra.mxu0 %v808_v50  ;;  %v707_v1 = vmax.f32 %v579_v53, 0.0  ;;  %v450_v4 = vld [vmem:[%s1377_s10 + $0x2b0] sm:$0xff]  ;;  %v574_v8 = vadd.f32 %v446_v3, %v318_v61  ;;  %v457_v12 = vld [vmem:[%s1377_s10 + $0x2e8] sm:$0xff]  ;;  %v581_v15 = vadd.f32 %v453_v11, %v325_v5 }
  0x56   : > { %v810_v63 = vpack.c.bf16 %v698_v51, %v694_v44  ;;  %v576_v2 = vadd.f32 %v448_v59, %v320_v55  ;;  %v813_v6 = vpack.c.bf16 %v705_v58, %v701_v57  ;;  %v578_v9 = vadd.f32 %v450_v4, %v322_v62  ;;  %v327_v17 = vld [vmem:[%s1372_s7 + $0x2d8] sm:$0xff]  ;;  %v324_v24 = vld [vmem:[%s1372_s7 + $0x2c0] sm:$0xff]  ;;  %v326_v32 = vld [vmem:[%s1372_s7 + $0x2d0] sm:$0xff] }
  0x57   : > { %v700_v7 = vmax.f32 %v572_v60, 0.0  ;;  %v815_v13 = vpack.c.bf16 %v707_v1, %v703_v0  ;;  %v585_v16 = vadd.f32 %v457_v12, %v329_v10  ;;  %v331_v18 = vld [vmem:[%s1372_s7 + $0x2f8] sm:$0xff]  ;;  %v702_v20 = vmax.f32 %v574_v8, 0.0  ;;  %v328_v25 = vld [vmem:[%s1372_s7 + $0x2e0] sm:$0xff]  ;;  %v330_v37 = vld [vmem:[%s1372_s7 + $0x2f0] sm:$0xff] }
  0x58   : > { %928 = vmatpush1.bf16.msra.mxu1 %v810_v63  ;;  %v704_v14 = vmax.f32 %v576_v2, 0.0  ;;  %v455_v19 = vld [vmem:[%s1377_s10 + $0x2d8] sm:$0xff]  ;;  %856 = vmatprep.subr.bf16.mxu0 %v813_v6  ;;  %v706_v21 = vmax.f32 %v578_v9, 0.0  ;;  %v709_v27 = vmax.f32 %v581_v15, 0.0  ;;  %v452_v30 = vld [vmem:[%s1377_s10 + $0x2c0] sm:$0xff]  ;;  %v454_v38 = vld [vmem:[%s1377_s10 + $0x2d0] sm:$0xff] }
  0x59   : > { %v459_v22 = vld [vmem:[%s1377_s10 + $0x2f8] sm:$0xff]  ;;  %v583_v23 = vadd.f32 %v455_v19, %v327_v17  ;;  %929 = vmatprep.subr.bf16.mxu1 %v815_v13  ;;  %v713_v28 = vmax.f32 %v585_v16, 0.0  ;;  %v456_v31 = vld [vmem:[%s1377_s10 + $0x2e0] sm:$0xff]  ;;  %v580_v35 = vadd.f32 %v452_v30, %v324_v24  ;;  %v458_v39 = vld [vmem:[%s1377_s10 + $0x2f0] sm:$0xff]  ;;  %v582_v42 = vadd.f32 %v454_v38, %v326_v32 }
  0x5a   : > { %v812_v26 = vpack.c.bf16 %v704_v14, %v700_v7  ;;  %v587_v29 = vadd.f32 %v459_v22, %v331_v18  ;;  %v814_v33 = vpack.c.bf16 %v706_v21, %v702_v20  ;;  %v584_v36 = vadd.f32 %v456_v31, %v328_v25  ;;  %v333_v44 = vld [vmem:[%s1372_s7 + $0x308] sm:$0xff]  ;;  %v335_v51 = vld [vmem:[%s1372_s7 + $0x318] sm:$0xff]  ;;  %v332_v59 = vld [vmem:[%s1372_s7 + $0x300] sm:$0xff] }
  0x5b   : > { %v711_v34 = vmax.f32 %v583_v23, 0.0  ;;  %v817_v40 = vpack.c.bf16 %v713_v28, %v709_v27  ;;  %v586_v43 = vadd.f32 %v458_v39, %v330_v37  ;;  %v337_v45 = vld [vmem:[%s1372_s7 + $0x328] sm:$0xff]  ;;  %v708_v47 = vmax.f32 %v580_v35, 0.0  ;;  %v339_v52 = vld [vmem:[%s1372_s7 + $0x338] sm:$0xff]  ;;  %v336_v0 = vld [vmem:[%s1372_s7 + $0x320] sm:$0xff] }
  0x5c   : > { %857 = vmatpush1.bf16.msra.mxu0 %v812_v26  ;;  %v715_v41 = vmax.f32 %v587_v29, 0.0  ;;  %v461_v46 = vld [vmem:[%s1377_s10 + $0x308] sm:$0xff]  ;;  %930 = vmatpush1.bf16.msra.mxu1 %v814_v33  ;;  %v712_v48 = vmax.f32 %v584_v36, 0.0  ;;  %v710_v54 = vmax.f32 %v582_v42, 0.0  ;;  %v463_v57 = vld [vmem:[%s1377_s10 + $0x318] sm:$0xff]  ;;  %v460_v1 = vld [vmem:[%s1377_s10 + $0x300] sm:$0xff] }
  0x5d   : > { %v465_v49 = vld [vmem:[%s1377_s10 + $0x328] sm:$0xff]  ;;  %v589_v50 = vadd.f32 %v461_v46, %v333_v44  ;;  %858 = vmatprep.subr.bf16.mxu0 %v817_v40  ;;  %v714_v55 = vmax.f32 %v586_v43, 0.0  ;;  %v467_v58 = vld [vmem:[%s1377_s10 + $0x338] sm:$0xff]  ;;  %v591_v62 = vadd.f32 %v463_v57, %v335_v51  ;;  %v464_v2 = vld [vmem:[%s1377_s10 + $0x320] sm:$0xff]  ;;  %v588_v5 = vadd.f32 %v460_v1, %v332_v59 }
  0x5e   : > { %v819_v53 = vpack.c.bf16 %v715_v41, %v711_v34  ;;  %v593_v56 = vadd.f32 %v465_v49, %v337_v45  ;;  %v816_v60 = vpack.c.bf16 %v712_v48, %v708_v47  ;;  %v595_v63 = vadd.f32 %v467_v58, %v339_v52  ;;  %v334_v7 = vld [vmem:[%s1372_s7 + $0x310] sm:$0xff]  ;;  %v341_v14 = vld [vmem:[%s1372_s7 + $0x348] sm:$0xff]  ;;  %v343_v22 = vld [vmem:[%s1372_s7 + $0x358] sm:$0xff] }
  0x5f   : > { %v717_v61 = vmax.f32 %v589_v50, 0.0  ;;  %v818_v3 = vpack.c.bf16 %v714_v55, %v710_v54  ;;  %v592_v6 = vadd.f32 %v464_v2, %v336_v0  ;;  %v338_v8 = vld [vmem:[%s1372_s7 + $0x330] sm:$0xff]  ;;  %v719_v10 = vmax.f32 %v591_v62, 0.0  ;;  %v345_v15 = vld [vmem:[%s1372_s7 + $0x368] sm:$0xff]  ;;  %v347_v27 = vld [vmem:[%s1372_s7 + $0x378] sm:$0xff] }
  0x60   : > { %931 = vmatprep.subr.bf16.mxu1 %v819_v53  ;;  %v721_v4 = vmax.f32 %v593_v56, 0.0  ;;  %v462_v9 = vld [vmem:[%s1377_s10 + $0x310] sm:$0xff]  ;;  %859 = vmatpush1.bf16.msra.mxu0 %v816_v60  ;;  %v723_v11 = vmax.f32 %v595_v63, 0.0  ;;  %v716_v17 = vmax.f32 %v588_v5, 0.0  ;;  %v469_v20 = vld [vmem:[%s1377_s10 + $0x348] sm:$0xff]  ;;  %v471_v28 = vld [vmem:[%s1377_s10 + $0x358] sm:$0xff] }
  0x61   : > { %v466_v12 = vld [vmem:[%s1377_s10 + $0x330] sm:$0xff]  ;;  %v590_v13 = vadd.f32 %v462_v9, %v334_v7  ;;  %932 = vmatpush1.bf16.msra.mxu1 %v818_v3  ;;  %v720_v18 = vmax.f32 %v592_v6, 0.0  ;;  %v473_v21 = vld [vmem:[%s1377_s10 + $0x368] sm:$0xff]  ;;  %v597_v25 = vadd.f32 %v469_v20, %v341_v14  ;;  %v475_v29 = vld [vmem:[%s1377_s10 + $0x378] sm:$0xff]  ;;  %v599_v32 = vadd.f32 %v471_v28, %v343_v22 }
  0x62   : > { %v821_v16 = vpack.c.bf16 %v721_v4, %v717_v61  ;;  %v594_v19 = vadd.f32 %v466_v12, %v338_v8  ;;  %v823_v23 = vpack.c.bf16 %v723_v11, %v719_v10  ;;  %v601_v26 = vadd.f32 %v473_v21, %v345_v15  ;;  %v340_v34 = vld [vmem:[%s1372_s7 + $0x340] sm:$0xff]  ;;  %v342_v41 = vld [vmem:[%s1372_s7 + $0x350] sm:$0xff]  ;;  %v349_v49 = vld [vmem:[%s1372_s7 + $0x388] sm:$0xff] }
  0x63   : > { %v718_v24 = vmax.f32 %v590_v13, 0.0  ;;  %v820_v30 = vpack.c.bf16 %v720_v18, %v716_v17  ;;  %v603_v33 = vadd.f32 %v475_v29, %v347_v27  ;;  %v344_v35 = vld [vmem:[%s1372_s7 + $0x360] sm:$0xff]  ;;  %v725_v37 = vmax.f32 %v597_v25, 0.0  ;;  %v346_v42 = vld [vmem:[%s1372_s7 + $0x370] sm:$0xff]  ;;  %v353_v54 = vld [vmem:[%s1372_s7 + $0x3a8] sm:$0xff] }
  0x64   : > { %860 = vmatprep.subr.bf16.mxu0 %v821_v16  ;;  %v722_v31 = vmax.f32 %v594_v19, 0.0  ;;  %v468_v36 = vld [vmem:[%s1377_s10 + $0x340] sm:$0xff]  ;;  %933 = vmatprep.subr.bf16.mxu1 %v823_v23  ;;  %v729_v38 = vmax.f32 %v601_v26, 0.0  ;;  %v727_v44 = vmax.f32 %v599_v32, 0.0  ;;  %v470_v47 = vld [vmem:[%s1377_s10 + $0x350] sm:$0xff]  ;;  %v477_v55 = vld [vmem:[%s1377_s10 + $0x388] sm:$0xff] }
  0x65   : > { %v472_v39 = vld [vmem:[%s1377_s10 + $0x360] sm:$0xff]  ;;  %v596_v40 = vadd.f32 %v468_v36, %v340_v34  ;;  %861 = vmatpush1.bf16.msra.mxu0 %v820_v30  ;;  %v731_v45 = vmax.f32 %v603_v33, 0.0  ;;  %v474_v48 = vld [vmem:[%s1377_s10 + $0x370] sm:$0xff]  ;;  %v598_v52 = vadd.f32 %v470_v47, %v342_v41  ;;  %v481_v56 = vld [vmem:[%s1377_s10 + $0x3a8] sm:$0xff]  ;;  %v605_v59 = vadd.f32 %v477_v55, %v349_v49 }
  0x66   : > { %v822_v43 = vpack.c.bf16 %v722_v31, %v718_v24  ;;  %v600_v46 = vadd.f32 %v472_v39, %v344_v35  ;;  %v825_v50 = vpack.c.bf16 %v729_v38, %v725_v37  ;;  %v602_v53 = vadd.f32 %v474_v48, %v346_v42  ;;  %v351_v61 = vld [vmem:[%s1372_s7 + $0x398] sm:$0xff]  ;;  %v348_v4 = vld [vmem:[%s1372_s7 + $0x380] sm:$0xff]  ;;  %v350_v12 = vld [vmem:[%s1372_s7 + $0x390] sm:$0xff] }
  0x67   : > { %v724_v51 = vmax.f32 %v596_v40, 0.0  ;;  %v827_v57 = vpack.c.bf16 %v731_v45, %v727_v44  ;;  %v609_v60 = vadd.f32 %v481_v56, %v353_v54  ;;  %v355_v62 = vld [vmem:[%s1372_s7 + $0x3b8] sm:$0xff]  ;;  %v726_v0 = vmax.f32 %v598_v52, 0.0  ;;  %v352_v5 = vld [vmem:[%s1372_s7 + $0x3a0] sm:$0xff]  ;;  %v354_v17 = vld [vmem:[%s1372_s7 + $0x3b0] sm:$0xff] }
  0x68   : > { %934 = vmatpush1.bf16.msra.mxu1 %v822_v43  ;;  %v728_v58 = vmax.f32 %v600_v46, 0.0  ;;  %v479_v63 = vld [vmem:[%s1377_s10 + $0x398] sm:$0xff]  ;;  %862 = vmatprep.subr.bf16.mxu0 %v825_v50  ;;  %v730_v1 = vmax.f32 %v602_v53, 0.0  ;;  %v733_v7 = vmax.f32 %v605_v59, 0.0  ;;  %v476_v10 = vld [vmem:[%s1377_s10 + $0x380] sm:$0xff]  ;;  %v478_v18 = vld [vmem:[%s1377_s10 + $0x390] sm:$0xff] }
  0x69   : > { %v483_v2 = vld [vmem:[%s1377_s10 + $0x3b8] sm:$0xff]  ;;  %v607_v3 = vadd.f32 %v479_v63, %v351_v61  ;;  %935 = vmatprep.subr.bf16.mxu1 %v827_v57  ;;  %v737_v8 = vmax.f32 %v609_v60, 0.0  ;;  %v480_v11 = vld [vmem:[%s1377_s10 + $0x3a0] sm:$0xff]  ;;  %v604_v15 = vadd.f32 %v476_v10, %v348_v4  ;;  %v482_v19 = vld [vmem:[%s1377_s10 + $0x3b0] sm:$0xff]  ;;  %v606_v22 = vadd.f32 %v478_v18, %v350_v12 }
  0x6a   : > { %v824_v6 = vpack.c.bf16 %v728_v58, %v724_v51  ;;  %v611_v9 = vadd.f32 %v483_v2, %v355_v62  ;;  %v826_v13 = vpack.c.bf16 %v730_v1, %v726_v0  ;;  %v608_v16 = vadd.f32 %v480_v11, %v352_v5  ;;  %v357_v24 = vld [vmem:[%s1372_s7 + $0x3c8] sm:$0xff]  ;;  %v359_v31 = vld [vmem:[%s1372_s7 + $0x3d8] sm:$0xff]  ;;  %v356_v39 = vld [vmem:[%s1372_s7 + $0x3c0] sm:$0xff] }
  0x6b   : > { %v735_v14 = vmax.f32 %v607_v3, 0.0  ;;  %v829_v20 = vpack.c.bf16 %v737_v8, %v733_v7  ;;  %v610_v23 = vadd.f32 %v482_v19, %v354_v17  ;;  %v361_v25 = vld [vmem:[%s1372_s7 + $0x3e8] sm:$0xff]  ;;  %v732_v27 = vmax.f32 %v604_v15, 0.0  ;;  %v363_v32 = vld [vmem:[%s1372_s7 + $0x3f8] sm:$0xff]  ;;  %v360_v44 = vld [vmem:[%s1372_s7 + $0x3e0] sm:$0xff] }
  0x6c   : > { %863 = vmatpush1.bf16.msra.mxu0 %v824_v6  ;;  %v739_v21 = vmax.f32 %v611_v9, 0.0  ;;  %v485_v26 = vld [vmem:[%s1377_s10 + $0x3c8] sm:$0xff]  ;;  %936 = vmatpush1.bf16.msra.mxu1 %v826_v13  ;;  %v736_v28 = vmax.f32 %v608_v16, 0.0  ;;  %v734_v34 = vmax.f32 %v606_v22, 0.0  ;;  %v487_v37 = vld [vmem:[%s1377_s10 + $0x3d8] sm:$0xff]  ;;  %v484_v45 = vld [vmem:[%s1377_s10 + $0x3c0] sm:$0xff] }
  0x6d   : > { %v489_v29 = vld [vmem:[%s1377_s10 + $0x3e8] sm:$0xff]  ;;  %v613_v30 = vadd.f32 %v485_v26, %v357_v24  ;;  %864 = vmatprep.subr.bf16.mxu0 %v829_v20  ;;  %v738_v35 = vmax.f32 %v610_v23, 0.0  ;;  %v491_v38 = vld [vmem:[%s1377_s10 + $0x3f8] sm:$0xff]  ;;  %v615_v42 = vadd.f32 %v487_v37, %v359_v31  ;;  %v488_v46 = vld [vmem:[%s1377_s10 + $0x3e0] sm:$0xff]  ;;  %v612_v49 = vadd.f32 %v484_v45, %v356_v39 }
  0x6e   : > { %v831_v33 = vpack.c.bf16 %v739_v21, %v735_v14  ;;  %v617_v36 = vadd.f32 %v489_v29, %v361_v25  ;;  %v828_v40 = vpack.c.bf16 %v736_v28, %v732_v27  ;;  %v619_v43 = vadd.f32 %v491_v38, %v363_v32  ;;  %v358_v51 = vld [vmem:[%s1372_s7 + $0x3d0] sm:$0xff]  ;;  %v748_v62 = vld [vmem:[%s1781_s2] sm:$0xff]  ;;  %v753_v2 = vld [vmem:[%s1781_s2 + $0x28] sm:$0xff] }
  0x6f   : > { %v741_v41 = vmax.f32 %v613_v30, 0.0  ;;  %v830_v47 = vpack.c.bf16 %v738_v35, %v734_v34  ;;  %v616_v50 = vadd.f32 %v488_v46, %v360_v44  ;;  %v362_v52 = vld [vmem:[%s1372_s7 + $0x3f0] sm:$0xff]  ;;  %v743_v54 = vmax.f32 %v615_v42, 0.0  ;;  %v755_v3 = vld [vmem:[%s1781_s2 + $0x38] sm:$0xff]  ;;  %v752_v9 = vld [vmem:[%s1781_s2 + $0x20] sm:$0xff]  ;;  %s1680_s7 = scalar_lea.vmem [#allocation2], %s1133_s6 }
  0x70   : > { %937 = vmatprep.subr.bf16.mxu1 %v831_v33  ;;  %v745_v48 = vmax.f32 %v617_v36, 0.0  ;;  %v486_v53 = vld [vmem:[%s1377_s10 + $0x3d0] sm:$0xff]  ;;  %865 = vmatpush1.bf16.msra.mxu0 %v828_v40  ;;  %v747_v55 = vmax.f32 %v619_v43, 0.0  ;;  %v740_v59 = vmax.f32 %v612_v49, 0.0  ;;  %v767_v8 = vpack.c.bf16 %v755_v3, %v753_v2  ;;  %v757_v11 = vld [vmem:[%s1781_s2 + $0x48] sm:$0xff]  ;;  %v759_v12 = vld [vmem:[%s1781_s2 + $0x58] sm:$0xff] }
  0x71   : > { %v490_v56 = vld [vmem:[%s1377_s10 + $0x3f0] sm:$0xff]  ;;  %v614_v57 = vadd.f32 %v486_v53, %v358_v51  ;;  %938 = vmatpush1.bf16.msra.mxu1 %v830_v47  ;;  %v744_v60 = vmax.f32 %v616_v50, 0.0  ;;  %v769_v14 = vpack.c.bf16 %v759_v12, %v757_v11  ;;  %v756_v15 = vld [vmem:[%s1781_s2 + $0x40] sm:$0xff]  ;;  %v761_v17 = vld [vmem:[%s1781_s2 + $0x68] sm:$0xff]  ;;  %s1031_s9 = sshll.u32 %s1680_s7, 4  ;;  %s1723_s9 = int_to_ptr.vmem [resolvable:$true] %s1031_s9 }
  0x72   : > { %v833_v58 = vpack.c.bf16 %v745_v48, %v741_v41  ;;  %v618_v61 = vadd.f32 %v490_v56, %v362_v52  ;;  %v750_v63 = vld [vmem:[%s1781_s2 + $0x10] sm:$0xff]  ;;  %v835_v0 = vpack.c.bf16 %v747_v55, %v743_v54  ;;  %v763_v18 = vld [vmem:[%s1781_s2 + $0x78] sm:$0xff]  ;;  %v760_v21 = vld [vmem:[%s1781_s2 + $0x60] sm:$0xff]  ;;  %s1203_s19 = scalar_lea.vmem %s1723_s9, 4096  ;;  %p1210_p1 = scmp.lt.s32.totalorder %s1723_s9, %s1208_s23 }
  0x73   : > { %v742_v1 = vmax.f32 %v614_v57, 0.0  ;;  %v832_v4 = vpack.c.bf16 %v744_v60, %v740_v59  ;;  %v764_v6 = vpack.c.bf16 %v750_v63, %v748_v62  ;;  %v754_v10 = vld [vmem:[%s1781_s2 + $0x30] sm:$0xff]  ;;  %v771_v20 = vpack.c.bf16 %v763_v18, %v761_v17  ;;  %p1204_p12 = scmp.ne.s32.totalorder %s1723_s9, %s1203_s19  ;;  %p1211_p2 = scmp.lt.s32.totalorder %s1209_s26, %s1203_s19 }
  0x74   : > { %866 = vmatprep.subr.bf16.mxu0 %v833_v58  ;;  %v746_v5 = vmax.f32 %v618_v61, 0.0  ;;  %939 = vmatprep.subr.bf16.mxu1 %v835_v0  ;;  %v766_v13 = vpack.c.bf16 %v754_v10, %v752_v9  ;;  %v758_v16 = vld [vmem:[%s1781_s2 + $0x50] sm:$0xff] }
  0x75   : > { %867 = vmatpush1.bf16.msra.mxu0 %v832_v4  ;;  %v768_v19 = vpack.c.bf16 %v758_v16, %v756_v15  ;;  %v762_v22 = vld [vmem:[%s1781_s2 + $0x70] sm:$0xff]  ;;  %p1205_p13 = pnand %p1204_p12, %p1346_p4  ;;  %p1212_p3 = por %p1211_p2, %p1210_p1 }
  0x76   : > { %v834_v7 = vpack.c.bf16 %v746_v5, %v742_v1  ;;  %v770_v23 = vpack.c.bf16 %v762_v22, %v760_v21 }
  0x77   : > { %p1206_p0 = pneg %p1205_p13 }
  0x78   : > { %940 = vmatpush1.bf16.msra.mxu1 %v834_v7  ;;  %869 = vmatmul.mubr.bf16.vlgmr.msra.gmra.mrb[0].mxu0 %v764_v6 }
  0x79   : > { %878 = vmatprep.mubr.bf16.mxu0 %v767_v8  ;;  %p1213_p5 = pnand %p1212_p3, %p1206_p0 }
  0x7b   : > { %942 = vmatmul.mubr.bf16.vlgmr.msra.gmra.mrb[0].mxu1 %v764_v6 }
  0x7c   : > { %951 = vmatprep.mubr.bf16.mxu1 %v767_v8 }
  0x80   : > { %879 = vmatmul.mubr.bf16.gmra.mrb[4].mxu0 %v766_v13 }
  0x81   : > { %888 = vmatprep.mubr.bf16.mxu0 %v769_v14 }
  0x83   : > { %952 = vmatmul.mubr.bf16.gmra.mrb[4].mxu1 %v766_v13 }
  0x84   : > { %961 = vmatprep.mubr.bf16.mxu1 %v769_v14 }
  0x88   : > { %889 = vmatmul.mubr.bf16.gmra.mrb[8].mxu0 %v768_v19 }
  0x89   : > { %898 = vmatprep.mubr.bf16.mxu0 %v771_v20 }
  0x8b   : > { %962 = vmatmul.mubr.bf16.gmra.mrb[8].mxu1 %v768_v19 }
  0x8c   : > { %971 = vmatprep.mubr.bf16.mxu1 %v771_v20 }
  0x90   : > { %899 = vmatmul.mubr.bf16.gmra.mrb[12].mxu0 %v770_v23 }
  0x93   : > { %972 = vmatmul.mubr.bf16.gmra.mrb[12].mxu1 %v770_v23 }
 0x14b   : > { %v870_v24 = vpop.f32.mrb[0].mxu0 }
 0x14c   : > { %982 = vst [vmem:[%s1680_s7] sm:$0xff] %v870_v24  ;;  %v872_v25 = vpop.f32.mrb[1].mxu0 }
 0x14d   : > { %983 = vst [vmem:[%s1680_s7 + $0x8] sm:$0xff] %v872_v25  ;;  %v874_v27 = vpop.f32.mrb[2].mxu0 }
 0x14e   : > { %v943_v26 = vpop.f32.mrb[0].mxu1  ;;  %987 = vst [vmem:[%s1680_s7 + $0x20] sm:$0xff] %v874_v27  ;;  %v876_v29 = vpop.f32.mrb[3].mxu0 }
 0x14f   : > { %984 = vst [vmem:[%s1680_s7 + $0x10] sm:$0xff] %v943_v26  ;;  %v945_v28 = vpop.f32.mrb[1].mxu1  ;;  %988 = vst [vmem:[%s1680_s7 + $0x28] sm:$0xff] %v876_v29 }
 0x150   : > { %986 = vst.msk [vmem:[%s1680_s7 + $0x18] sm:$0xff] %vm985_vm0, %v945_v28  ;;  %v947_v30 = vpop.f32.mrb[2].mxu1 }
 0x151   : > { %989 = vst [vmem:[%s1680_s7 + $0x30] sm:$0xff] %v947_v30  ;;  %v949_v31 = vpop.f32.mrb[3].mxu1 }
 0x152   : > { %990 = vst.msk [vmem:[%s1680_s7 + $0x38] sm:$0xff] %vm985_vm0, %v949_v31 }
 0x153   : > { %v880_v32 = vpop.f32.mrb[4].mxu0 }
 0x154   : > { %991 = vst [vmem:[%s1680_s7 + $0x40] sm:$0xff] %v880_v32  ;;  %v882_v33 = vpop.f32.mrb[5].mxu0 }
 0x155   : > { %992 = vst [vmem:[%s1680_s7 + $0x48] sm:$0xff] %v882_v33  ;;  %v884_v35 = vpop.f32.mrb[6].mxu0 }
 0x156   : > { %v953_v34 = vpop.f32.mrb[4].mxu1  ;;  %995 = vst [vmem:[%s1680_s7 + $0x60] sm:$0xff] %v884_v35  ;;  %v886_v37 = vpop.f32.mrb[7].mxu0 }
 0x157   : > { %993 = vst [vmem:[%s1680_s7 + $0x50] sm:$0xff] %v953_v34  ;;  %v955_v36 = vpop.f32.mrb[5].mxu1  ;;  %996 = vst [vmem:[%s1680_s7 + $0x68] sm:$0xff] %v886_v37 }
 0x158   : > { %994 = vst.msk [vmem:[%s1680_s7 + $0x58] sm:$0xff] %vm985_vm0, %v955_v36  ;;  %v957_v38 = vpop.f32.mrb[6].mxu1 }
 0x159   : > { %997 = vst [vmem:[%s1680_s7 + $0x70] sm:$0xff] %v957_v38  ;;  %v959_v39 = vpop.f32.mrb[7].mxu1 }
 0x15a   : > { %998 = vst.msk [vmem:[%s1680_s7 + $0x78] sm:$0xff] %vm985_vm0, %v959_v39 }
 0x15b   : > { %v890_v40 = vpop.f32.mrb[8].mxu0 }
 0x15c   : > { %999 = vst [vmem:[%s1680_s7 + $0x80] sm:$0xff] %v890_v40  ;;  %v892_v41 = vpop.f32.mrb[9].mxu0 }
 0x15d   : > { %1000 = vst [vmem:[%s1680_s7 + $0x88] sm:$0xff] %v892_v41  ;;  %v894_v43 = vpop.f32.mrb[10].mxu0 }
 0x15e   : > { %v963_v42 = vpop.f32.mrb[8].mxu1  ;;  %1003 = vst [vmem:[%s1680_s7 + $0xa0] sm:$0xff] %v894_v43  ;;  %v896_v45 = vpop.f32.mrb[11].mxu0 }
 0x15f   : > { %1001 = vst [vmem:[%s1680_s7 + $0x90] sm:$0xff] %v963_v42  ;;  %v965_v44 = vpop.f32.mrb[9].mxu1  ;;  %1004 = vst [vmem:[%s1680_s7 + $0xa8] sm:$0xff] %v896_v45 }
 0x160   : > { %1002 = vst.msk [vmem:[%s1680_s7 + $0x98] sm:$0xff] %vm985_vm0, %v965_v44  ;;  %v967_v46 = vpop.f32.mrb[10].mxu1 }
 0x161   : > { %1005 = vst [vmem:[%s1680_s7 + $0xb0] sm:$0xff] %v967_v46  ;;  %v969_v47 = vpop.f32.mrb[11].mxu1 }
 0x162   : > { %1006 = vst.msk [vmem:[%s1680_s7 + $0xb8] sm:$0xff] %vm985_vm0, %v969_v47 }
 0x163   : > { %v900_v48 = vpop.f32.mrb[12].mxu0 }
 0x164   : > { %1007 = vst [vmem:[%s1680_s7 + $0xc0] sm:$0xff] %v900_v48  ;;  %v902_v49 = vpop.f32.mrb[13].mxu0 }
 0x165   : > { %1008 = vst [vmem:[%s1680_s7 + $0xc8] sm:$0xff] %v902_v49  ;;  %v904_v51 = vpop.f32.mrb[14].mxu0 }
 0x166   : > { %v973_v50 = vpop.f32.mrb[12].mxu1  ;;  %1011 = vst [vmem:[%s1680_s7 + $0xe0] sm:$0xff] %v904_v51  ;;  %v906_v53 = vpop.f32.mrb[15].mxu0 }
 0x167   : > { %1009 = vst [vmem:[%s1680_s7 + $0xd0] sm:$0xff] %v973_v50  ;;  %v975_v52 = vpop.f32.mrb[13].mxu1  ;;  %1012 = vst [vmem:[%s1680_s7 + $0xe8] sm:$0xff] %v906_v53 }
 0x168   : > { %1010 = vst.msk [vmem:[%s1680_s7 + $0xd8] sm:$0xff] %vm985_vm0, %v975_v52  ;;  %v977_v54 = vpop.f32.mrb[14].mxu1 }
 0x169   : > { %1013 = vst [vmem:[%s1680_s7 + $0xf0] sm:$0xff] %v977_v54  ;;  %v979_v55 = vpop.f32.mrb[15].mxu1 }
 0x16a   : > { %1014 = vst.msk [vmem:[%s1680_s7 + $0xf8] sm:$0xff] %vm985_vm0, %v979_v55 }
 0x16b   : > { %1216 = shalt.err (!%p1213_p5)
}
 0x16c   : > { %s1217_s27 = scalar_lea.hbm %s1721_s18, 4096  ;;  %s1221_s30 = scalar_lea.hbm %s1782_s3, 8192 }
 0x16d   : > { %p1218_p6 = scmp.ne.s32.totalorder %s1721_s18, %s1217_s27  ;;  %p1222_p10 = scmp.lt.u32.totalorder %s1721_s18, %s1782_s3 }
 0x16e   : > { %p1223_p11 = scmp.lt.u32.totalorder %s1221_s30, %s1217_s27  ;;  %p1225_p13 = scmp.lt.u32.totalorder %s1217_s27, %s1721_s18 }
 0x16f   : > { %p1219_p7 = pnand %p1218_p6, %p1346_p4 }
 0x170   : > { %p1224_p12 = por %p1223_p11, %p1222_p10 }
 0x171   : > { %p1220_p9 = pneg %p1219_p7 }
 0x172   : > { %p1226_p0 = por %p1225_p13, %p1224_p12 }
 0x174   : > { %p1227_p1 = pnand %p1226_p0, %p1220_p9 }
 0x176   : > { %1230 = shalt.err (!%p1227_p1)
}
 0x177   : > { %s1284_s6 = smov 512   ;;  %s1285_s7 = smov 32  }
 0x178   : > { %1146 = dma.vmem_to_hbm [thread:$0]  (%p1346_p4), %s1723_s9, 4096, %s1721_s18, %s1733_s15, %s1284_s6, %s1284_s6, %s1285_s7  }
 0x179 PF: > { %p1152_p2 = scmp.ge.s32.totalorder %s1281_s17, 2  ;;  %s1046_s8 = sand.u32 1, %s1261_s12  }
 0x17a   : > { %s1047_s10 = scalar_lea.sflag [#allocation3], %s1046_s8 }
 0x17b   : > { %p1149_p3 = pnand %p1152_p2, %p1353_p8 }
 0x17d   : > { %1256 = dma.done.wait (!%p1149_p3), %s1047_s10, 4096  }
 0x17e   : > { %1258 = vsyncadd (!%p1149_p3), %s1047_s10, 4294963200  ;;  %s16_s17 = sadd.s32 1, %s1281_s17   ;;  %s1785_s12 = smov %s1265_s13 }
 0x17f   : > { %p13_p5 = scmp.ge.s32.totalorder %s16_s17, 4   ;;  %s1786_s13 = smov %s1269_s14 }
 0x180   : > { %s1787_s14 = smov %s1359_s25  ;;  %s1788_s15 = smov %s1277_s16 }
 0x181   : > { %s1789_s16 = smov %s1791_s20  ;;  %15 = sbr.rel (!%p13_p5) target bundleno = 4 (0x4), region = 70 }
 0x188   :  { %1052 = vsyncpa [#allocation3], 1 }
 0x189   :  { %1054 = vsyncpa [#allocation3 + $0x1], 1 }

</bundles_post_ra>
